<compile_context>
chip_gen: v7x
topology: tpu7x:2x2x1
jax: 0.10.0
libtpu: 0.0.40
codegen_flags: <defaults>
</compile_context>

<pallas_src>
import functools

import jax
import jax.numpy as jnp
from jax.experimental import pallas as pl
from jax.experimental.pallas import tpu as pltpu


def _make_up_kernel(L1, L2, C, p, q, fast):
    """Builds the fused Up kernel (one batch element per grid step)."""

    def kernel(x1_ref, x2_ref, wt_ref, bt_ref, w1_ref, b1_ref, w2_ref, b2_ref,
               o_ref, cin_ref, hp_ref):
        # x1_ref : (1, L1, Cin)        wt_ref : (Cin, 2C)   bt_ref : (1, 2C)
        # x2_ref : (1, L2, C)          w1_ref : (6C, C)     b1_ref : (1, C)
        #                              w2_ref : (3C, C)     b2_ref : (1, C)
        # o_ref  : (1, L2, C)
        # cin_ref: (L2+2, 2C) scratch  -- halo-padded concat [x2 | upsampled x1]
        # hp_ref : (L2+2, C)  scratch  -- halo-padded hidden activation
        f32 = jnp.float32

        # ---- ConvTranspose1d(k=2, s=2): one MXU matmul, K = Cin ------------------
        # zz[l, k*C + co] = sum_ci x1[l, ci] * Wt[ci, co, k] + bt[co]
        zz = jnp.dot(x1_ref[0].astype(f32), wt_ref[...],
                     preferred_element_type=f32) + bt_ref[...]

        # ---- build halo'd conv1 input in VMEM (zero only the rows that need it) --
        # rows [0, 1+p) are left pad/halo, rows [1+p+2*L1, L2+2) are right pad/halo.
        cin_ref[0:1 + p, :] = jnp.zeros((1 + p, 2 * C), f32)
        cin_ref[1 + p + 2 * L1:L2 + 2, :] = jnp.zeros((q + 1, 2 * C), f32)
        # x2 occupies lanes [0:C], rows 1..L2   (torch.cat([x2, x1], dim=1) order)
        cin_ref[1:L2 + 1, 0:C] = x2_ref[0].astype(f32)
        # upsampled x1 occupies lanes [C:2C]: row 1+p+2l+k <- zz[l, k*C:(k+1)*C]
        if fast:
            # sublane-strided scatter does the 2x interleave in two stores
            cin_ref[pl.ds(1 + p, L1, 2), C:2 * C] = zz[:, 0:C]
            cin_ref[pl.ds(2 + p, L1, 2), C:2 * C] = zz[:, C:2 * C]
        else:
            for l in range(L1):
                cin_ref[1 + p + 2 * l:2 + p + 2 * l, C:2 * C] = zz[l:l + 1, 0:C]
                cin_ref[2 + p + 2 * l:3 + p + 2 * l, C:2 * C] = zz[l:l + 1, C:2 * C]

        # ---- conv1 (k=3, pad=1) + ReLU -------------------------------------------
        cin = cin_ref[...]                                        # (L2+2, 2C)
        if fast:
            # im2col along lanes: one dot with K = 6C
            cat1 = jnp.concatenate(
                [cin[0:L2], cin[1:L2 + 1], cin[2:L2 + 2]], axis=1)  # (L2, 6C)
            h = jnp.dot(cat1, w1_ref[...], preferred_element_type=f32)
        else:
            h = (jnp.dot(cin[0:L2], w1_ref[0:2 * C, :], preferred_element_type=f32)
                 + jnp.dot(cin[1:L2 + 1], w1_ref[2 * C:4 * C, :],
                           preferred_element_type=f32)
                 + jnp.dot(cin[2:L2 + 2], w1_ref[4 * C:6 * C, :],
                           preferred_element_type=f32))
        h = jnp.maximum(h + b1_ref[...], 0.0)                     # (L2, C)

        # ---- conv2 (k=3, pad=1) + ReLU -------------------------------------------
        hp_ref[0:1, :] = jnp.zeros((1, C), f32)
        hp_ref[L2 + 1:L2 + 2, :] = jnp.zeros((1, C), f32)
        hp_ref[1:L2 + 1, :] = h
        hp = hp_ref[...]                                          # (L2+2, C)
        if fast:
            cat2 = jnp.concatenate(
                [hp[0:L2], hp[1:L2 + 1], hp[2:L2 + 2]], axis=1)    # (L2, 3C)
            y = jnp.dot(cat2, w2_ref[...], preferred_element_type=f32)
        else:
            y = (jnp.dot(hp[0:L2], w2_ref[0:C, :], preferred_element_type=f32)
                 + jnp.dot(hp[1:L2 + 1], w2_ref[C:2 * C, :],
                           preferred_element_type=f32)
                 + jnp.dot(hp[2:L2 + 2], w2_ref[2 * C:3 * C, :],
                           preferred_element_type=f32))
        y = jnp.maximum(y + b2_ref[...], 0.0)
        o_ref[0] = y.astype(o_ref.dtype)

    return kernel


@functools.partial(jax.jit, static_argnames=("fast",))
def up_forward(x1, x2, params, fast=True):
    """x1: (B, L1, Cin); x2: (B, L2, Cout); channels-last activations."""
    Wt, bt, W1, b1, W2, b2 = params
    B, L1, Cin = x1.shape
    _, L2, C = x2.shape
    diff = L2 - 2 * L1
    # TODO(synk): PyTorch's F.pad with negative diff (crop) is not handled.
    assert diff >= 0, "expected L2 >= 2 * L1"
    p, q = diff // 2, diff - diff // 2

    # ConvTranspose1d weight (Cin, Cout, 2) -> (Cin, 2*Cout) with col = k*Cout + co
    wt_flat = jnp.transpose(Wt, (0, 2, 1)).reshape(Cin, 2 * C)
    bt_flat = jnp.tile(bt, 2).reshape(1, 2 * C)
    # Conv1d weights (k, in, out) -> (k*in, out); row = j*in + cin matches the
    # kernel's im2col column order (tap-major, channels ordered [x2 | upsampled x1]).
    w1_flat = W1.reshape(6 * C, C)
    w2_flat = W2.reshape(3 * C, C)
    b1_2d = b1.reshape(1, C)
    b2_2d = b2.reshape(1, C)

    kernel = _make_up_kernel(L1, L2, C, p, q, fast)

    # TODO(synk): for long sequences, add a second parallel grid axis tiling L2 with
    # a 1-row halo so both v7x TensorCores are fed and VMEM per step stays bounded.
    return pl.pallas_call(
        kernel,
        out_shape=jax.ShapeDtypeStruct((B, L2, C), x2.dtype),
        grid=(B,),
        in_specs=[
            pl.BlockSpec((1, L1, Cin), lambda b: (b, 0, 0)),
            pl.BlockSpec((1, L2, C), lambda b: (b, 0, 0)),
            pl.BlockSpec((Cin, 2 * C), lambda b: (0, 0)),
            pl.BlockSpec((1, 2 * C), lambda b: (0, 0)),
            pl.BlockSpec((6 * C, C), lambda b: (0, 0)),
            pl.BlockSpec((1, C), lambda b: (0, 0)),
            pl.BlockSpec((3 * C, C), lambda b: (0, 0)),
            pl.BlockSpec((1, C), lambda b: (0, 0)),
        ],
        out_specs=pl.BlockSpec((1, L2, C), lambda b: (b, 0, 0)),
        scratch_shapes=[
            pltpu.VMEM((L2 + 2, 2 * C), jnp.float32),   # halo'd [x2 | up(x1)]
            pltpu.VMEM((L2 + 2, C), jnp.float32),       # halo'd hidden activation
        ],
        compiler_params=pltpu.CompilerParams(
            dimension_semantics=("parallel",)),
    )(x1, x2, wt_flat, bt_flat, w1_flat, b1_2d, w2_flat, b2_2d)


# ------------------------------------------------------------------------------
# Pure-JAX reference (matches PyTorch semantics) for verification
# ------------------------------------------------------------------------------
def _ref_conv1d(x, W, b):
    # x: (B, L, Cin_); W: (3, Cin_, Cout_); b: (Cout_,); kernel=3, pad=1
    B, L, _ = x.shape
    xp = jnp.pad(x, ((0, 0), (1, 1), (0, 0)))
    y = sum(jnp.einsum('blc,co->blo', xp[:, k:k + L, :], W[k]) for k in range(3))
    return y + b


def ref_forward(x1, x2, params):
    Wt, bt, W1, b1, W2, b2 = params
    B, L1, _ = x1.shape
    C = Wt.shape[1]
    # ConvTranspose1d(k=2, s=2): out[:, 2l+k, co] = sum_ci x1[:, l, ci]*Wt[ci, co, k] + bt[co]
    z = jnp.einsum('blc,cok->blko', x1, Wt)                 # (B, L1, 2, C)
    z = z.reshape(B, 2 * L1, C) + bt
    L2 = x2.shape[1]
    diff = L2 - 2 * L1
    z = jnp.pad(z, ((0, 0), (diff // 2, diff - diff // 2), (0, 0)))
    x = jnp.concatenate([x2, z], axis=-1)                   # channel concat [x2, x1]
    h = jax.nn.relu(_ref_conv1d(x, W1, b1))
    return jax.nn.relu(_ref_conv1d(h, W2, b2))


if __name__ == "__main__":
    B, Cin, Cout = 2, 8, 4
    L1, L2 = 8, 18          # diff = L2 - 2*L1 = 2 exercises the center-pad path
    dtype = jnp.float32

    key = jax.random.PRNGKey(0)
    k = jax.random.split(key, 8)
    x1 = jax.random.normal(k[0], (B, L1, Cin), dtype)       # channels-last (B, L, C)
    x2 = jax.random.normal(k[1], (B, L2, Cout), dtype)

    # deterministic synthetic parameters (PyTorch layouts noted)
    Wt = 0.1 * jax.random.normal(k[2], (Cin, Cout, 2), dtype)       # ConvTranspose1d (in, out, k)
    bt = 0.1 * jax.random.normal(k[3], (Cout,), dtype)
    W1 = 0.1 * jax.random.normal(k[4], (3, 2 * Cout, Cout), dtype)  # Conv1d #1 (k, in, out)
    b1 = 0.1 * jax.random.normal(k[5], (Cout,), dtype)
    W2 = 0.1 * jax.random.normal(k[6], (3, Cout, Cout), dtype)      # Conv1d #2 (k, in, out)
    b2 = 0.1 * jax.random.normal(k[7], (Cout,), dtype)
    params = (Wt, bt, W1, b1, W2, b2)

    ref = ref_forward(x1, x2, params)

    def run_and_check(fast):
        out = jax.block_until_ready(up_forward(x1, x2, params, fast=fast))
        assert out.shape == (B, L2, Cout), out.shape
        assert jnp.allclose(out, ref, rtol=1e-4, atol=1e-4), \
            f"max abs err {jnp.max(jnp.abs(out - ref))}"
        return out

    try:
        out = run_and_check(fast=True)
    except Exception:
        # Fast path uses a sublane-strided scatter + minor-dim concats (im2col);
        # if the local Mosaic build rejects either, rerun the portable variant.
        out = run_and_check(fast=False)

    print("KERNEL_OK")
</pallas_src>

<mosaic_0001>
module attributes {stable_mosaic.version = 11 : i64} {
  func.func @kernel(%arg0: i32, %arg1: memref<1x8x8xf32, #tpu.memory_space<vmem>>, %arg2: memref<1x18x4xf32, #tpu.memory_space<vmem>>, %arg3: memref<8x8xf32, #tpu.memory_space<vmem>>, %arg4: memref<1x8xf32, #tpu.memory_space<vmem>>, %arg5: memref<24x4xf32, #tpu.memory_space<vmem>>, %arg6: memref<1x4xf32, #tpu.memory_space<vmem>>, %arg7: memref<12x4xf32, #tpu.memory_space<vmem>>, %arg8: memref<1x4xf32, #tpu.memory_space<vmem>>, %arg9: memref<1x18x4xf32, #tpu.memory_space<vmem>>, %arg10: memref<20x8xf32, #tpu.memory_space<vmem>>, %arg11: memref<20x4xf32, #tpu.memory_space<vmem>>) attributes {dimension_semantics = [#tpu.dimension_semantics<parallel>], iteration_bounds = array<i64: 2>, scalar_prefetch = 0 : i64, scratch_operands = 2 : i64, tpu.core_type = #tpu.core_type<tc>, window_params = [{transform_indices = @transform_0, window_bounds = array<i64: 1, 8, 8>}, {transform_indices = @transform_1, window_bounds = array<i64: 1, 18, 4>}, {pipeline_mode = #tpu.pipeline_mode<synchronous>, transform_indices = @transform_2, window_bounds = array<i64: 8, 8>}, {pipeline_mode = #tpu.pipeline_mode<synchronous>, transform_indices = @transform_3, window_bounds = array<i64: 1, 8>}, {pipeline_mode = #tpu.pipeline_mode<synchronous>, transform_indices = @transform_4, window_bounds = array<i64: 24, 4>}, {pipeline_mode = #tpu.pipeline_mode<synchronous>, transform_indices = @transform_5, window_bounds = array<i64: 1, 4>}, {pipeline_mode = #tpu.pipeline_mode<synchronous>, transform_indices = @transform_6, window_bounds = array<i64: 12, 4>}, {pipeline_mode = #tpu.pipeline_mode<synchronous>, transform_indices = @transform_7, window_bounds = array<i64: 1, 4>}, {transform_indices = @transform_8, window_bounds = array<i64: 1, 18, 4>}]} {
    %c0 = arith.constant 0 : index
    %c0_0 = arith.constant 0 : index
    %c0_1 = arith.constant 0 : index
    %0 = vector.load %arg1[%c0, %c0_0, %c0_1] : memref<1x8x8xf32, #tpu.memory_space<vmem>>, vector<1x8x8xf32>
    %1 = vector.shape_cast %0 : vector<1x8x8xf32> to vector<8x8xf32>
    %c0_2 = arith.constant 0 : index
    %c0_3 = arith.constant 0 : index
    %2 = vector.load %arg3[%c0_2, %c0_3] : memref<8x8xf32, #tpu.memory_space<vmem>>, vector<8x8xf32>
    %cst = arith.constant dense<0.000000e+00> : vector<8x8xf32>
    %3 = tpu.matmul %1, %2, %cst {dimension_numbers = #tpu.dot_dimension_numbers<[1], [0], [0], [1], [0, 0, 1, 1], [], []>} : vector<8x8xf32>, vector<8x8xf32>, vector<8x8xf32> -> vector<8x8xf32>
    %c0_4 = arith.constant 0 : index
    %c0_5 = arith.constant 0 : index
    %4 = vector.load %arg4[%c0_4, %c0_5] : memref<1x8xf32, #tpu.memory_space<vmem>>, vector<1x8xf32>
    %5 = vector.broadcast %4 : vector<1x8xf32> to vector<8x8xf32>
    %6 = arith.addf %3, %5 : vector<8x8xf32>
    %cst_6 = arith.constant 0.000000e+00 : f32
    %7 = vector.broadcast %cst_6 : f32 to vector<2x8xf32>
    %c0_7 = arith.constant 0 : index
    %c0_8 = arith.constant 0 : index
    %8 = vector.load %arg10[%c0_7, %c0_8] : memref<20x8xf32, #tpu.memory_space<vmem>>, vector<2x8xf32>
    tpu.vector_store %arg10[%c0_7, %c0_8], %7 {strides = array<i32>} : memref<20x8xf32, #tpu.memory_space<vmem>>, vector<2x8xf32>,
    %cst_9 = arith.constant 0.000000e+00 : f32
    %9 = vector.broadcast %cst_9 : f32 to vector<2x8xf32>
    %c18 = arith.constant 18 : index
    %c0_10 = arith.constant 0 : index
    %10 = vector.load %arg10[%c18, %c0_10] : memref<20x8xf32, #tpu.memory_space<vmem>>, vector<2x8xf32>
    tpu.vector_store %arg10[%c18, %c0_10], %9 {strides = array<i32>} : memref<20x8xf32, #tpu.memory_space<vmem>>, vector<2x8xf32>,
    %c0_11 = arith.constant 0 : index
    %c0_12 = arith.constant 0 : index
    %c0_13 = arith.constant 0 : index
    %11 = vector.load %arg2[%c0_11, %c0_12, %c0_13] : memref<1x18x4xf32, #tpu.memory_space<vmem>>, vector<1x18x4xf32>
    %12 = vector.shape_cast %11 : vector<1x18x4xf32> to vector<18x4xf32>
    %c1 = arith.constant 1 : index
    %c0_14 = arith.constant 0 : index
    %13 = vector.load %arg10[%c1, %c0_14] : memref<20x8xf32, #tpu.memory_space<vmem>>, vector<18x4xf32>
    tpu.vector_store %arg10[%c1, %c0_14], %12 {strides = array<i32>} : memref<20x8xf32, #tpu.memory_space<vmem>>, vector<18x4xf32>,
    %14 = vector.extract_strided_slice %6 {offsets = [0, 0], sizes = [8, 4], strides = [1, 1]} : vector<8x8xf32> to vector<8x4xf32>
    %c2 = arith.constant 2 : index
    %c4 = arith.constant 4 : index
    %15 = tpu.strided_load %arg10[%c2, %c4] {strides = array<i32: 2, 1>} : memref<20x8xf32, #tpu.memory_space<vmem>>, vector<8x4xf32>
    tpu.strided_store %arg10[%c2, %c4], %14 {strides = array<i32: 2, 1>} : memref<20x8xf32, #tpu.memory_space<vmem>>, vector<8x4xf32>
    %16 = vector.extract_strided_slice %6 {offsets = [0, 4], sizes = [8, 4], strides = [1, 1]} : vector<8x8xf32> to vector<8x4xf32>
    %c3 = arith.constant 3 : index
    %c4_15 = arith.constant 4 : index
    %17 = tpu.strided_load %arg10[%c3, %c4_15] {strides = array<i32: 2, 1>} : memref<20x8xf32, #tpu.memory_space<vmem>>, vector<8x4xf32>
    tpu.strided_store %arg10[%c3, %c4_15], %16 {strides = array<i32: 2, 1>} : memref<20x8xf32, #tpu.memory_space<vmem>>, vector<8x4xf32>
    %c0_16 = arith.constant 0 : index
    %c0_17 = arith.constant 0 : index
    %18 = vector.load %arg10[%c0_16, %c0_17] : memref<20x8xf32, #tpu.memory_space<vmem>>, vector<20x8xf32>
    %19 = vector.extract_strided_slice %18 {offsets = [0, 0], sizes = [18, 8], strides = [1, 1]} : vector<20x8xf32> to vector<18x8xf32>
    %20 = vector.extract_strided_slice %18 {offsets = [1, 0], sizes = [18, 8], strides = [1, 1]} : vector<20x8xf32> to vector<18x8xf32>
    %21 = vector.extract_strided_slice %18 {offsets = [2, 0], sizes = [18, 8], strides = [1, 1]} : vector<20x8xf32> to vector<18x8xf32>
    %22 = tpu.concatenate %19, %20, %21 in 1 : vector<18x8xf32>, vector<18x8xf32>, vector<18x8xf32> -> vector<18x24xf32>
    %c0_18 = arith.constant 0 : index
    %c0_19 = arith.constant 0 : index
    %23 = vector.load %arg5[%c0_18, %c0_19] : memref<24x4xf32, #tpu.memory_space<vmem>>, vector<24x4xf32>
    %cst_20 = arith.constant dense<0.000000e+00> : vector<18x4xf32>
    %24 = tpu.matmul %22, %23, %cst_20 {dimension_numbers = #tpu.dot_dimension_numbers<[1], [0], [0], [1], [0, 0, 1, 1], [], []>} : vector<18x24xf32>, vector<24x4xf32>, vector<18x4xf32> -> vector<18x4xf32>
    %c0_21 = arith.constant 0 : index
    %c0_22 = arith.constant 0 : index
    %25 = vector.load %arg6[%c0_21, %c0_22] : memref<1x4xf32, #tpu.memory_space<vmem>>, vector<1x4xf32>
    %26 = vector.broadcast %25 : vector<1x4xf32> to vector<18x4xf32>
    %27 = arith.addf %24, %26 : vector<18x4xf32>
    %cst_23 = arith.constant 0.000000e+00 : f32
    %28 = vector.broadcast %cst_23 : f32 to vector<18x4xf32>
    %29 = arith.maximumf %27, %28 : vector<18x4xf32>
    %cst_24 = arith.constant 0.000000e+00 : f32
    %30 = vector.broadcast %cst_24 : f32 to vector<1x4xf32>
    %c0_25 = arith.constant 0 : index
    %c0_26 = arith.constant 0 : index
    %31 = vector.load %arg11[%c0_25, %c0_26] : memref<20x4xf32, #tpu.memory_space<vmem>>, vector<1x4xf32>
    tpu.vector_store %arg11[%c0_25, %c0_26], %30 {strides = array<i32>} : memref<20x4xf32, #tpu.memory_space<vmem>>, vector<1x4xf32>,
    %cst_27 = arith.constant 0.000000e+00 : f32
    %32 = vector.broadcast %cst_27 : f32 to vector<1x4xf32>
    %c19 = arith.constant 19 : index
    %c0_28 = arith.constant 0 : index
    %33 = vector.load %arg11[%c19, %c0_28] : memref<20x4xf32, #tpu.memory_space<vmem>>, vector<1x4xf32>
    tpu.vector_store %arg11[%c19, %c0_28], %32 {strides = array<i32>} : memref<20x4xf32, #tpu.memory_space<vmem>>, vector<1x4xf32>,
    %c1_29 = arith.constant 1 : index
    %c0_30 = arith.constant 0 : index
    %34 = vector.load %arg11[%c1_29, %c0_30] : memref<20x4xf32, #tpu.memory_space<vmem>>, vector<18x4xf32>
    tpu.vector_store %arg11[%c1_29, %c0_30], %29 {strides = array<i32>} : memref<20x4xf32, #tpu.memory_space<vmem>>, vector<18x4xf32>,
    %c0_31 = arith.constant 0 : index
    %c0_32 = arith.constant 0 : index
    %35 = vector.load %arg11[%c0_31, %c0_32] : memref<20x4xf32, #tpu.memory_space<vmem>>, vector<20x4xf32>
    %36 = vector.extract_strided_slice %35 {offsets = [0, 0], sizes = [18, 4], strides = [1, 1]} : vector<20x4xf32> to vector<18x4xf32>
    %37 = vector.extract_strided_slice %35 {offsets = [1, 0], sizes = [18, 4], strides = [1, 1]} : vector<20x4xf32> to vector<18x4xf32>
    %38 = vector.extract_strided_slice %35 {offsets = [2, 0], sizes = [18, 4], strides = [1, 1]} : vector<20x4xf32> to vector<18x4xf32>
    %39 = tpu.concatenate %36, %37, %38 in 1 : vector<18x4xf32>, vector<18x4xf32>, vector<18x4xf32> -> vector<18x12xf32>
    %c0_33 = arith.constant 0 : index
    %c0_34 = arith.constant 0 : index
    %40 = vector.load %arg7[%c0_33, %c0_34] : memref<12x4xf32, #tpu.memory_space<vmem>>, vector<12x4xf32>
    %cst_35 = arith.constant dense<0.000000e+00> : vector<18x4xf32>
    %41 = tpu.matmul %39, %40, %cst_35 {dimension_numbers = #tpu.dot_dimension_numbers<[1], [0], [0], [1], [0, 0, 1, 1], [], []>} : vector<18x12xf32>, vector<12x4xf32>, vector<18x4xf32> -> vector<18x4xf32>
    %c0_36 = arith.constant 0 : index
    %c0_37 = arith.constant 0 : index
    %42 = vector.load %arg8[%c0_36, %c0_37] : memref<1x4xf32, #tpu.memory_space<vmem>>, vector<1x4xf32>
    %43 = vector.broadcast %42 : vector<1x4xf32> to vector<18x4xf32>
    %44 = arith.addf %41, %43 : vector<18x4xf32>
    %cst_38 = arith.constant 0.000000e+00 : f32
    %45 = vector.broadcast %cst_38 : f32 to vector<18x4xf32>
    %46 = arith.maximumf %44, %45 : vector<18x4xf32>
    %c0_39 = arith.constant 0 : index
    %c0_40 = arith.constant 0 : index
    %c0_41 = arith.constant 0 : index
    %47 = vector.load %arg9[%c0_39, %c0_40, %c0_41] : memref<1x18x4xf32, #tpu.memory_space<vmem>>, vector<1x18x4xf32>
    %48 = vector.shape_cast %47 : vector<1x18x4xf32> to vector<18x4xf32>
    %49 = vector.shape_cast %46 : vector<18x4xf32> to vector<1x18x4xf32>
    tpu.vector_store %arg9[%c0_39, %c0_40, %c0_41], %49 {strides = array<i32>} : memref<1x18x4xf32, #tpu.memory_space<vmem>>, vector<1x18x4xf32>,
    return
  }
  func.func @transform_0(%arg0: i32) -> (i32, i32, i32) {
    %c0_i32 = arith.constant 0 : i32
    %c0_i32_0 = arith.constant 0 : i32
    %c0_i32_1 = arith.constant 0 : i32
    return %arg0, %c0_i32, %c0_i32_0 : i32, i32, i32
  }
  func.func @transform_1(%arg0: i32) -> (i32, i32, i32) {
    %c0_i32 = arith.constant 0 : i32
    %c0_i32_0 = arith.constant 0 : i32
    %c0_i32_1 = arith.constant 0 : i32
    return %arg0, %c0_i32, %c0_i32_0 : i32, i32, i32
  }
  func.func @transform_2(%arg0: i32) -> (i32, i32) {
    %c0_i32 = arith.constant 0 : i32
    %c0_i32_0 = arith.constant 0 : i32
    %c0_i32_1 = arith.constant 0 : i32
    return %c0_i32, %c0_i32_0 : i32, i32
  }
  func.func @transform_3(%arg0: i32) -> (i32, i32) {
    %c0_i32 = arith.constant 0 : i32
    %c0_i32_0 = arith.constant 0 : i32
    %c0_i32_1 = arith.constant 0 : i32
    return %c0_i32, %c0_i32_0 : i32, i32
  }
  func.func @transform_4(%arg0: i32) -> (i32, i32) {
    %c0_i32 = arith.constant 0 : i32
    %c0_i32_0 = arith.constant 0 : i32
    %c0_i32_1 = arith.constant 0 : i32
    return %c0_i32, %c0_i32_0 : i32, i32
  }
  func.func @transform_5(%arg0: i32) -> (i32, i32) {
    %c0_i32 = arith.constant 0 : i32
    %c0_i32_0 = arith.constant 0 : i32
    %c0_i32_1 = arith.constant 0 : i32
    return %c0_i32, %c0_i32_0 : i32, i32
  }
  func.func @transform_6(%arg0: i32) -> (i32, i32) {
    %c0_i32 = arith.constant 0 : i32
    %c0_i32_0 = arith.constant 0 : i32
    %c0_i32_1 = arith.constant 0 : i32
    return %c0_i32, %c0_i32_0 : i32, i32
  }
  func.func @transform_7(%arg0: i32) -> (i32, i32) {
    %c0_i32 = arith.constant 0 : i32
    %c0_i32_0 = arith.constant 0 : i32
    %c0_i32_1 = arith.constant 0 : i32
    return %c0_i32, %c0_i32_0 : i32, i32
  }
  func.func @transform_8(%arg0: i32) -> (i32, i32, i32) {
    %c0_i32 = arith.constant 0 : i32
    %c0_i32_0 = arith.constant 0 : i32
    %c0_i32_1 = arith.constant 0 : i32
    return %arg0, %c0_i32, %c0_i32_0 : i32, i32, i32
  }
}

module attributes {stable_mosaic.version = 11 : i64} {
  func.func @kernel(%arg0: i32, %arg1: memref<1x8x8xf32, #tpu.memory_space<vmem>>, %arg2: memref<1x18x4xf32, #tpu.memory_space<vmem>>, %arg3: memref<8x8xf32, #tpu.memory_space<vmem>>, %arg4: memref<1x8xf32, #tpu.memory_space<vmem>>, %arg5: memref<24x4xf32, #tpu.memory_space<vmem>>, %arg6: memref<1x4xf32, #tpu.memory_space<vmem>>, %arg7: memref<12x4xf32, #tpu.memory_space<vmem>>, %arg8: memref<1x4xf32, #tpu.memory_space<vmem>>, %arg9: memref<1x18x4xf32, #tpu.memory_space<vmem>>, %arg10: memref<20x8xf32, #tpu.memory_space<vmem>>, %arg11: memref<20x4xf32, #tpu.memory_space<vmem>>) attributes {dimension_semantics = [#tpu.dimension_semantics<parallel>], iteration_bounds = array<i64: 2>, scalar_prefetch = 0 : i64, scratch_operands = 2 : i64, tpu.core_type = #tpu.core_type<tc>, window_params = [{transform_indices = @transform_0, window_bounds = array<i64: 1, 8, 8>}, {transform_indices = @transform_1, window_bounds = array<i64: 1, 18, 4>}, {pipeline_mode = #tpu.pipeline_mode<synchronous>, transform_indices = @transform_2, window_bounds = array<i64: 8, 8>}, {pipeline_mode = #tpu.pipeline_mode<synchronous>, transform_indices = @transform_3, window_bounds = array<i64: 1, 8>}, {pipeline_mode = #tpu.pipeline_mode<synchronous>, transform_indices = @transform_4, window_bounds = array<i64: 24, 4>}, {pipeline_mode = #tpu.pipeline_mode<synchronous>, transform_indices = @transform_5, window_bounds = array<i64: 1, 4>}, {pipeline_mode = #tpu.pipeline_mode<synchronous>, transform_indices = @transform_6, window_bounds = array<i64: 12, 4>}, {pipeline_mode = #tpu.pipeline_mode<synchronous>, transform_indices = @transform_7, window_bounds = array<i64: 1, 4>}, {transform_indices = @transform_8, window_bounds = array<i64: 1, 18, 4>}]} {
    %c0 = arith.constant 0 : index
    %c0_0 = arith.constant 0 : index
    %c0_1 = arith.constant 0 : index
    %0 = vector.load %arg1[%c0, %c0_0, %c0_1] : memref<1x8x8xf32, #tpu.memory_space<vmem>>, vector<1x8x8xf32>
    %1 = vector.shape_cast %0 : vector<1x8x8xf32> to vector<8x8xf32>
    %c0_2 = arith.constant 0 : index
    %c0_3 = arith.constant 0 : index
    %2 = vector.load %arg3[%c0_2, %c0_3] : memref<8x8xf32, #tpu.memory_space<vmem>>, vector<8x8xf32>
    %cst = arith.constant dense<0.000000e+00> : vector<8x8xf32>
    %3 = tpu.matmul %1, %2, %cst {dimension_numbers = #tpu.dot_dimension_numbers<[1], [0], [0], [1], [0, 0, 1, 1], [], []>} : vector<8x8xf32>, vector<8x8xf32>, vector<8x8xf32> -> vector<8x8xf32>
    %c0_4 = arith.constant 0 : index
    %c0_5 = arith.constant 0 : index
    %4 = vector.load %arg4[%c0_4, %c0_5] : memref<1x8xf32, #tpu.memory_space<vmem>>, vector<1x8xf32>
    %5 = vector.broadcast %4 : vector<1x8xf32> to vector<8x8xf32>
    %6 = arith.addf %3, %5 : vector<8x8xf32>
    %cst_6 = arith.constant 0.000000e+00 : f32
    %7 = vector.broadcast %cst_6 : f32 to vector<2x8xf32>
    %c0_7 = arith.constant 0 : index
    %c0_8 = arith.constant 0 : index
    %8 = vector.load %arg10[%c0_7, %c0_8] : memref<20x8xf32, #tpu.memory_space<vmem>>, vector<2x8xf32>
    tpu.vector_store %arg10[%c0_7, %c0_8], %7 {strides = array<i32>} : memref<20x8xf32, #tpu.memory_space<vmem>>, vector<2x8xf32>,
    %cst_9 = arith.constant 0.000000e+00 : f32
    %9 = vector.broadcast %cst_9 : f32 to vector<2x8xf32>
    %c18 = arith.constant 18 : index
    %c0_10 = arith.constant 0 : index
    %10 = vector.load %arg10[%c18, %c0_10] : memref<20x8xf32, #tpu.memory_space<vmem>>, vector<2x8xf32>
    tpu.vector_store %arg10[%c18, %c0_10], %9 {strides = array<i32>} : memref<20x8xf32, #tpu.memory_space<vmem>>, vector<2x8xf32>,
    %c0_11 = arith.constant 0 : index
    %c0_12 = arith.constant 0 : index
    %c0_13 = arith.constant 0 : index
    %11 = vector.load %arg2[%c0_11, %c0_12, %c0_13] : memref<1x18x4xf32, #tpu.memory_space<vmem>>, vector<1x18x4xf32>
    %12 = vector.shape_cast %11 : vector<1x18x4xf32> to vector<18x4xf32>
    %c1 = arith.constant 1 : index
    %c0_14 = arith.constant 0 : index
    %13 = vector.load %arg10[%c1, %c0_14] : memref<20x8xf32, #tpu.memory_space<vmem>>, vector<18x4xf32>
    tpu.vector_store %arg10[%c1, %c0_14], %12 {strides = array<i32>} : memref<20x8xf32, #tpu.memory_space<vmem>>, vector<18x4xf32>,
    %14 = vector.extract_strided_slice %6 {offsets = [0, 0], sizes = [1, 4], strides = [1, 1]} : vector<8x8xf32> to vector<1x4xf32>
    %c2 = arith.constant 2 : index
    %c4 = arith.constant 4 : index
    %15 = vector.load %arg10[%c2, %c4] : memref<20x8xf32, #tpu.memory_space<vmem>>, vector<1x4xf32>
    tpu.vector_store %arg10[%c2, %c4], %14 {strides = array<i32>} : memref<20x8xf32, #tpu.memory_space<vmem>>, vector<1x4xf32>,
    %16 = vector.extract_strided_slice %6 {offsets = [0, 4], sizes = [1, 4], strides = [1, 1]} : vector<8x8xf32> to vector<1x4xf32>
    %c3 = arith.constant 3 : index
    %c4_15 = arith.constant 4 : index
    %17 = vector.load %arg10[%c3, %c4_15] : memref<20x8xf32, #tpu.memory_space<vmem>>, vector<1x4xf32>
    tpu.vector_store %arg10[%c3, %c4_15], %16 {strides = array<i32>} : memref<20x8xf32, #tpu.memory_space<vmem>>, vector<1x4xf32>,
    %18 = vector.extract_strided_slice %6 {offsets = [1, 0], sizes = [1, 4], strides = [1, 1]} : vector<8x8xf32> to vector<1x4xf32>
    %c4_16 = arith.constant 4 : index
    %c4_17 = arith.constant 4 : index
    %19 = vector.load %arg10[%c4_16, %c4_17] : memref<20x8xf32, #tpu.memory_space<vmem>>, vector<1x4xf32>
    tpu.vector_store %arg10[%c4_16, %c4_17], %18 {strides = array<i32>} : memref<20x8xf32, #tpu.memory_space<vmem>>, vector<1x4xf32>,
    %20 = vector.extract_strided_slice %6 {offsets = [1, 4], sizes = [1, 4], strides = [1, 1]} : vector<8x8xf32> to vector<1x4xf32>
    %c5 = arith.constant 5 : index
    %c4_18 = arith.constant 4 : index
    %21 = vector.load %arg10[%c5, %c4_18] : memref<20x8xf32, #tpu.memory_space<vmem>>, vector<1x4xf32>
    tpu.vector_store %arg10[%c5, %c4_18], %20 {strides = array<i32>} : memref<20x8xf32, #tpu.memory_space<vmem>>, vector<1x4xf32>,
    %22 = vector.extract_strided_slice %6 {offsets = [2, 0], sizes = [1, 4], strides = [1, 1]} : vector<8x8xf32> to vector<1x4xf32>
    %c6 = arith.constant 6 : index
    %c4_19 = arith.constant 4 : index
    %23 = vector.load %arg10[%c6, %c4_19] : memref<20x8xf32, #tpu.memory_space<vmem>>, vector<1x4xf32>
    tpu.vector_store %arg10[%c6, %c4_19], %22 {strides = array<i32>} : memref<20x8xf32, #tpu.memory_space<vmem>>, vector<1x4xf32>,
    %24 = vector.extract_strided_slice %6 {offsets = [2, 4], sizes = [1, 4], strides = [1, 1]} : vector<8x8xf32> to vector<1x4xf32>
    %c7 = arith.constant 7 : index
    %c4_20 = arith.constant 4 : index
    %25 = vector.load %arg10[%c7, %c4_20] : memref<20x8xf32, #tpu.memory_space<vmem>>, vector<1x4xf32>
    tpu.vector_store %arg10[%c7, %c4_20], %24 {strides = array<i32>} : memref<20x8xf32, #tpu.memory_space<vmem>>, vector<1x4xf32>,
    %26 = vector.extract_strided_slice %6 {offsets = [3, 0], sizes = [1, 4], strides = [1, 1]} : vector<8x8xf32> to vector<1x4xf32>
    %c8 = arith.constant 8 : index
    %c4_21 = arith.constant 4 : index
    %27 = vector.load %arg10[%c8, %c4_21] : memref<20x8xf32, #tpu.memory_space<vmem>>, vector<1x4xf32>
    tpu.vector_store %arg10[%c8, %c4_21], %26 {strides = array<i32>} : memref<20x8xf32, #tpu.memory_space<vmem>>, vector<1x4xf32>,
    %28 = vector.extract_strided_slice %6 {offsets = [3, 4], sizes = [1, 4], strides = [1, 1]} : vector<8x8xf32> to vector<1x4xf32>
    %c9 = arith.constant 9 : index
    %c4_22 = arith.constant 4 : index
    %29 = vector.load %arg10[%c9, %c4_22] : memref<20x8xf32, #tpu.memory_space<vmem>>, vector<1x4xf32>
    tpu.vector_store %arg10[%c9, %c4_22], %28 {strides = array<i32>} : memref<20x8xf32, #tpu.memory_space<vmem>>, vector<1x4xf32>,
    %30 = vector.extract_strided_slice %6 {offsets = [4, 0], sizes = [1, 4], strides = [1, 1]} : vector<8x8xf32> to vector<1x4xf32>
    %c10 = arith.constant 10 : index
    %c4_23 = arith.constant 4 : index
    %31 = vector.load %arg10[%c10, %c4_23] : memref<20x8xf32, #tpu.memory_space<vmem>>, vector<1x4xf32>
    tpu.vector_store %arg10[%c10, %c4_23], %30 {strides = array<i32>} : memref<20x8xf32, #tpu.memory_space<vmem>>, vector<1x4xf32>,
    %32 = vector.extract_strided_slice %6 {offsets = [4, 4], sizes = [1, 4], strides = [1, 1]} : vector<8x8xf32> to vector<1x4xf32>
    %c11 = arith.constant 11 : index
    %c4_24 = arith.constant 4 : index
    %33 = vector.load %arg10[%c11, %c4_24] : memref<20x8xf32, #tpu.memory_space<vmem>>, vector<1x4xf32>
    tpu.vector_store %arg10[%c11, %c4_24], %32 {strides = array<i32>} : memref<20x8xf32, #tpu.memory_space<vmem>>, vector<1x4xf32>,
    %34 = vector.extract_strided_slice %6 {offsets = [5, 0], sizes = [1, 4], strides = [1, 1]} : vector<8x8xf32> to vector<1x4xf32>
    %c12 = arith.constant 12 : index
    %c4_25 = arith.constant 4 : index
    %35 = vector.load %arg10[%c12, %c4_25] : memref<20x8xf32, #tpu.memory_space<vmem>>, vector<1x4xf32>
    tpu.vector_store %arg10[%c12, %c4_25], %34 {strides = array<i32>} : memref<20x8xf32, #tpu.memory_space<vmem>>, vector<1x4xf32>,
    %36 = vector.extract_strided_slice %6 {offsets = [5, 4], sizes = [1, 4], strides = [1, 1]} : vector<8x8xf32> to vector<1x4xf32>
    %c13 = arith.constant 13 : index
    %c4_26 = arith.constant 4 : index
    %37 = vector.load %arg10[%c13, %c4_26] : memref<20x8xf32, #tpu.memory_space<vmem>>, vector<1x4xf32>
    tpu.vector_store %arg10[%c13, %c4_26], %36 {strides = array<i32>} : memref<20x8xf32, #tpu.memory_space<vmem>>, vector<1x4xf32>,
    %38 = vector.extract_strided_slice %6 {offsets = [6, 0], sizes = [1, 4], strides = [1, 1]} : vector<8x8xf32> to vector<1x4xf32>
    %c14 = arith.constant 14 : index
    %c4_27 = arith.constant 4 : index
    %39 = vector.load %arg10[%c14, %c4_27] : memref<20x8xf32, #tpu.memory_space<vmem>>, vector<1x4xf32>
    tpu.vector_store %arg10[%c14, %c4_27], %38 {strides = array<i32>} : memref<20x8xf32, #tpu.memory_space<vmem>>, vector<1x4xf32>,
    %40 = vector.extract_strided_slice %6 {offsets = [6, 4], sizes = [1, 4], strides = [1, 1]} : vector<8x8xf32> to vector<1x4xf32>
    %c15 = arith.constant 15 : index
    %c4_28 = arith.constant 4 : index
    %41 = vector.load %arg10[%c15, %c4_28] : memref<20x8xf32, #tpu.memory_space<vmem>>, vector<1x4xf32>
    tpu.vector_store %arg10[%c15, %c4_28], %40 {strides = array<i32>} : memref<20x8xf32, #tpu.memory_space<vmem>>, vector<1x4xf32>,
    %42 = vector.extract_strided_slice %6 {offsets = [7, 0], sizes = [1, 4], strides = [1, 1]} : vector<8x8xf32> to vector<1x4xf32>
    %c16 = arith.constant 16 : index
    %c4_29 = arith.constant 4 : index
    %43 = vector.load %arg10[%c16, %c4_29] : memref<20x8xf32, #tpu.memory_space<vmem>>, vector<1x4xf32>
    tpu.vector_store %arg10[%c16, %c4_29], %42 {strides = array<i32>} : memref<20x8xf32, #tpu.memory_space<vmem>>, vector<1x4xf32>,
    %44 = vector.extract_strided_slice %6 {offsets = [7, 4], sizes = [1, 4], strides = [1, 1]} : vector<8x8xf32> to vector<1x4xf32>
    %c17 = arith.constant 17 : index
    %c4_30 = arith.constant 4 : index
    %45 = vector.load %arg10[%c17, %c4_30] : memref<20x8xf32, #tpu.memory_space<vmem>>, vector<1x4xf32>
    tpu.vector_store %arg10[%c17, %c4_30], %44 {strides = array<i32>} : memref<20x8xf32, #tpu.memory_space<vmem>>, vector<1x4xf32>,
    %c0_31 = arith.constant 0 : index
    %c0_32 = arith.constant 0 : index
    %46 = vector.load %arg10[%c0_31, %c0_32] : memref<20x8xf32, #tpu.memory_space<vmem>>, vector<20x8xf32>
    %47 = vector.extract_strided_slice %46 {offsets = [0, 0], sizes = [18, 8], strides = [1, 1]} : vector<20x8xf32> to vector<18x8xf32>
    %c0_33 = arith.constant 0 : index
    %c0_34 = arith.constant 0 : index
    %48 = vector.load %arg5[%c0_33, %c0_34] : memref<24x4xf32, #tpu.memory_space<vmem>>, vector<8x4xf32>
    %cst_35 = arith.constant dense<0.000000e+00> : vector<18x4xf32>
    %49 = tpu.matmul %47, %48, %cst_35 {dimension_numbers = #tpu.dot_dimension_numbers<[1], [0], [0], [1], [0, 0, 1, 1], [], []>} : vector<18x8xf32>, vector<8x4xf32>, vector<18x4xf32> -> vector<18x4xf32>
    %50 = vector.extract_strided_slice %46 {offsets = [1, 0], sizes = [18, 8], strides = [1, 1]} : vector<20x8xf32> to vector<18x8xf32>
    %c8_36 = arith.constant 8 : index
    %c0_37 = arith.constant 0 : index
    %51 = vector.load %arg5[%c8_36, %c0_37] : memref<24x4xf32, #tpu.memory_space<vmem>>, vector<8x4xf32>
    %cst_38 = arith.constant dense<0.000000e+00> : vector<18x4xf32>
    %52 = tpu.matmul %50, %51, %cst_38 {dimension_numbers = #tpu.dot_dimension_numbers<[1], [0], [0], [1], [0, 0, 1, 1], [], []>} : vector<18x8xf32>, vector<8x4xf32>, vector<18x4xf32> -> vector<18x4xf32>
    %53 = arith.addf %49, %52 : vector<18x4xf32>
    %54 = vector.extract_strided_slice %46 {offsets = [2, 0], sizes = [18, 8], strides = [1, 1]} : vector<20x8xf32> to vector<18x8xf32>
    %c16_39 = arith.constant 16 : index
    %c0_40 = arith.constant 0 : index
    %55 = vector.load %arg5[%c16_39, %c0_40] : memref<24x4xf32, #tpu.memory_space<vmem>>, vector<8x4xf32>
    %cst_41 = arith.constant dense<0.000000e+00> : vector<18x4xf32>
    %56 = tpu.matmul %54, %55, %cst_41 {dimension_numbers = #tpu.dot_dimension_numbers<[1], [0], [0], [1], [0, 0, 1, 1], [], []>} : vector<18x8xf32>, vector<8x4xf32>, vector<18x4xf32> -> vector<18x4xf32>
    %57 = arith.addf %53, %56 : vector<18x4xf32>
    %c0_42 = arith.constant 0 : index
    %c0_43 = arith.constant 0 : index
    %58 = vector.load %arg6[%c0_42, %c0_43] : memref<1x4xf32, #tpu.memory_space<vmem>>, vector<1x4xf32>
    %59 = vector.broadcast %58 : vector<1x4xf32> to vector<18x4xf32>
    %60 = arith.addf %57, %59 : vector<18x4xf32>
    %cst_44 = arith.constant 0.000000e+00 : f32
    %61 = vector.broadcast %cst_44 : f32 to vector<18x4xf32>
    %62 = arith.maximumf %60, %61 : vector<18x4xf32>
    %cst_45 = arith.constant 0.000000e+00 : f32
    %63 = vector.broadcast %cst_45 : f32 to vector<1x4xf32>
    %c0_46 = arith.constant 0 : index
    %c0_47 = arith.constant 0 : index
    %64 = vector.load %arg11[%c0_46, %c0_47] : memref<20x4xf32, #tpu.memory_space<vmem>>, vector<1x4xf32>
    tpu.vector_store %arg11[%c0_46, %c0_47], %63 {strides = array<i32>} : memref<20x4xf32, #tpu.memory_space<vmem>>, vector<1x4xf32>,
    %cst_48 = arith.constant 0.000000e+00 : f32
    %65 = vector.broadcast %cst_48 : f32 to vector<1x4xf32>
    %c19 = arith.constant 19 : index
    %c0_49 = arith.constant 0 : index
    %66 = vector.load %arg11[%c19, %c0_49] : memref<20x4xf32, #tpu.memory_space<vmem>>, vector<1x4xf32>
    tpu.vector_store %arg11[%c19, %c0_49], %65 {strides = array<i32>} : memref<20x4xf32, #tpu.memory_space<vmem>>, vector<1x4xf32>,
    %c1_50 = arith.constant 1 : index
    %c0_51 = arith.constant 0 : index
    %67 = vector.load %arg11[%c1_50, %c0_51] : memref<20x4xf32, #tpu.memory_space<vmem>>, vector<18x4xf32>
    tpu.vector_store %arg11[%c1_50, %c0_51], %62 {strides = array<i32>} : memref<20x4xf32, #tpu.memory_space<vmem>>, vector<18x4xf32>,
    %c0_52 = arith.constant 0 : index
    %c0_53 = arith.constant 0 : index
    %68 = vector.load %arg11[%c0_52, %c0_53] : memref<20x4xf32, #tpu.memory_space<vmem>>, vector<20x4xf32>
    %69 = vector.extract_strided_slice %68 {offsets = [0, 0], sizes = [18, 4], strides = [1, 1]} : vector<20x4xf32> to vector<18x4xf32>
    %c0_54 = arith.constant 0 : index
    %c0_55 = arith.constant 0 : index
    %70 = vector.load %arg7[%c0_54, %c0_55] : memref<12x4xf32, #tpu.memory_space<vmem>>, vector<4x4xf32>
    %cst_56 = arith.constant dense<0.000000e+00> : vector<18x4xf32>
    %71 = tpu.matmul %69, %70, %cst_56 {dimension_numbers = #tpu.dot_dimension_numbers<[1], [0], [0], [1], [0, 0, 1, 1], [], []>} : vector<18x4xf32>, vector<4x4xf32>, vector<18x4xf32> -> vector<18x4xf32>
    %72 = vector.extract_strided_slice %68 {offsets = [1, 0], sizes = [18, 4], strides = [1, 1]} : vector<20x4xf32> to vector<18x4xf32>
    %c4_57 = arith.constant 4 : index
    %c0_58 = arith.constant 0 : index
    %73 = vector.load %arg7[%c4_57, %c0_58] : memref<12x4xf32, #tpu.memory_space<vmem>>, vector<4x4xf32>
    %cst_59 = arith.constant dense<0.000000e+00> : vector<18x4xf32>
    %74 = tpu.matmul %72, %73, %cst_59 {dimension_numbers = #tpu.dot_dimension_numbers<[1], [0], [0], [1], [0, 0, 1, 1], [], []>} : vector<18x4xf32>, vector<4x4xf32>, vector<18x4xf32> -> vector<18x4xf32>
    %75 = arith.addf %71, %74 : vector<18x4xf32>
    %76 = vector.extract_strided_slice %68 {offsets = [2, 0], sizes = [18, 4], strides = [1, 1]} : vector<20x4xf32> to vector<18x4xf32>
    %c8_60 = arith.constant 8 : index
    %c0_61 = arith.constant 0 : index
    %77 = vector.load %arg7[%c8_60, %c0_61] : memref<12x4xf32, #tpu.memory_space<vmem>>, vector<4x4xf32>
    %cst_62 = arith.constant dense<0.000000e+00> : vector<18x4xf32>
    %78 = tpu.matmul %76, %77, %cst_62 {dimension_numbers = #tpu.dot_dimension_numbers<[1], [0], [0], [1], [0, 0, 1, 1], [], []>} : vector<18x4xf32>, vector<4x4xf32>, vector<18x4xf32> -> vector<18x4xf32>
    %79 = arith.addf %75, %78 : vector<18x4xf32>
    %c0_63 = arith.constant 0 : index
    %c0_64 = arith.constant 0 : index
    %80 = vector.load %arg8[%c0_63, %c0_64] : memref<1x4xf32, #tpu.memory_space<vmem>>, vector<1x4xf32>
    %81 = vector.broadcast %80 : vector<1x4xf32> to vector<18x4xf32>
    %82 = arith.addf %79, %81 : vector<18x4xf32>
    %cst_65 = arith.constant 0.000000e+00 : f32
    %83 = vector.broadcast %cst_65 : f32 to vector<18x4xf32>
    %84 = arith.maximumf %82, %83 : vector<18x4xf32>
    %c0_66 = arith.constant 0 : index
    %c0_67 = arith.constant 0 : index
    %c0_68 = arith.constant 0 : index
    %85 = vector.load %arg9[%c0_66, %c0_67, %c0_68] : memref<1x18x4xf32, #tpu.memory_space<vmem>>, vector<1x18x4xf32>
    %86 = vector.shape_cast %85 : vector<1x18x4xf32> to vector<18x4xf32>
    %87 = vector.shape_cast %84 : vector<18x4xf32> to vector<1x18x4xf32>
    tpu.vector_store %arg9[%c0_66, %c0_67, %c0_68], %87 {strides = array<i32>} : memref<1x18x4xf32, #tpu.memory_space<vmem>>, vector<1x18x4xf32>,
    return
  }
  func.func @transform_0(%arg0: i32) -> (i32, i32, i32) {
    %c0_i32 = arith.constant 0 : i32
    %c0_i32_0 = arith.constant 0 : i32
    %c0_i32_1 = arith.constant 0 : i32
    return %arg0, %c0_i32, %c0_i32_0 : i32, i32, i32
  }
  func.func @transform_1(%arg0: i32) -> (i32, i32, i32) {
    %c0_i32 = arith.constant 0 : i32
    %c0_i32_0 = arith.constant 0 : i32
    %c0_i32_1 = arith.constant 0 : i32
    return %arg0, %c0_i32, %c0_i32_0 : i32, i32, i32
  }
  func.func @transform_2(%arg0: i32) -> (i32, i32) {
    %c0_i32 = arith.constant 0 : i32
    %c0_i32_0 = arith.constant 0 : i32
    %c0_i32_1 = arith.constant 0 : i32
    return %c0_i32, %c0_i32_0 : i32, i32
  }
  func.func @transform_3(%arg0: i32) -> (i32, i32) {
    %c0_i32 = arith.constant 0 : i32
    %c0_i32_0 = arith.constant 0 : i32
    %c0_i32_1 = arith.constant 0 : i32
    return %c0_i32, %c0_i32_0 : i32, i32
  }
  func.func @transform_4(%arg0: i32) -> (i32, i32) {
    %c0_i32 = arith.constant 0 : i32
    %c0_i32_0 = arith.constant 0 : i32
    %c0_i32_1 = arith.constant 0 : i32
    return %c0_i32, %c0_i32_0 : i32, i32
  }
  func.func @transform_5(%arg0: i32) -> (i32, i32) {
    %c0_i32 = arith.constant 0 : i32
    %c0_i32_0 = arith.constant 0 : i32
    %c0_i32_1 = arith.constant 0 : i32
    return %c0_i32, %c0_i32_0 : i32, i32
  }
  func.func @transform_6(%arg0: i32) -> (i32, i32) {
    %c0_i32 = arith.constant 0 : i32
    %c0_i32_0 = arith.constant 0 : i32
    %c0_i32_1 = arith.constant 0 : i32
    return %c0_i32, %c0_i32_0 : i32, i32
  }
  func.func @transform_7(%arg0: i32) -> (i32, i32) {
    %c0_i32 = arith.constant 0 : i32
    %c0_i32_0 = arith.constant 0 : i32
    %c0_i32_1 = arith.constant 0 : i32
    return %c0_i32, %c0_i32_0 : i32, i32
  }
  func.func @transform_8(%arg0: i32) -> (i32, i32, i32) {
    %c0_i32 = arith.constant 0 : i32
    %c0_i32_0 = arith.constant 0 : i32
    %c0_i32_1 = arith.constant 0 : i32
    return %arg0, %c0_i32, %c0_i32_0 : i32, i32, i32
  }
}

</mosaic_0001>

<bundles_post_ra>
// kernel: tile.8
= control target key start
LH: loop header
LB: loop body
LE: loop exit
PB: predicated region body
PF: predicated region fallthrough
CT: control target
= control target key end

     0   :  { %s22_s0 = inlined_call_operand.vmem [shape: f32[4], index: 0, kind: input, shape index: {}]   ;;  %s23_s1 = inlined_call_operand.vmem [shape: f32[2,4], index: 1, kind: output, shape index: {}]  }
   0x1   :  { %v4_v0 = vld [vmem:[%s22_s0] ss:$0 sm:$0xff] }
   0x2   :  { %5 = vst [vmem:[%s23_s1] sm:$0x3] %v4_v0 }

// kernel: tile.9
= control target key start
LH: loop header
LB: loop body
LE: loop exit
PB: predicated region body
PF: predicated region fallthrough
CT: control target
= control target key end

     0   :  { %vm7_vm0 = vcmask 31744   ;;  %vm13_vm1 = vcmask 64544   ;;  %s39_s0 = inlined_call_operand.vmem [shape: f32[2,4], index: 0, kind: input, shape index: {}]   ;;  %s40_s1 = inlined_call_operand.vmem [shape: f32[1,8], index: 1, kind: output, shape index: {}]  }
   0x1   :  { %v4_v0 = vld [vmem:[%s39_s0] sm:$0x3]  ;;  %s22_s0 = smov 4  }
   0x2   :  { %5 = vst [vmem:[#allocation1] sm:$0x3] %v4_v0 }
   0x9   :  { %v10_v1 = vld [vmem:[#allocation1 + $0x1] sm:$0x1]   ;;  %v6_v2 = vld [vmem:[#allocation1] sm:$0x1]  }
   0xa   :  { %11 = vrot.lane.b32.xlu0 %v10_v1, %s22_s0  ;;  %8 = vst.msk [vmem:[#allocation0] sm:$0x1] %vm7_vm0, %v6_v2  }
  0x7c   :  { %v12_v3 = vpop.permute.xlu0 %11  }
  0x7d   :  { %14 = vst.msk [vmem:[#allocation0] sm:$0x1] %vm13_vm1, %v12_v3  }
  0x84   :  { %v18_v4 = vld [vmem:[#allocation0] sm:$0x1] }
  0x85   :  { %20 = vst [vmem:[%s40_s1] sm:$0x1] %v18_v4 }

// kernel: tile.9
= control target key start
LH: loop header
LB: loop body
LE: loop exit
PB: predicated region body
PF: predicated region fallthrough
CT: control target
= control target key end

     0   :  { %vm7_vm0 = vcmask 31744   ;;  %vm13_vm1 = vcmask 64544   ;;  %s39_s0 = inlined_call_operand.vmem [shape: f32[2,4], index: 0, kind: input, shape index: {}]   ;;  %s40_s1 = inlined_call_operand.vmem [shape: f32[1,8], index: 1, kind: output, shape index: {}]  }
   0x1   :  { %v4_v0 = vld [vmem:[%s39_s0] sm:$0x3]  ;;  %s22_s0 = smov 4  }
   0x2   :  { %5 = vst [vmem:[#allocation1] sm:$0x3] %v4_v0 }
   0x9   :  { %v10_v1 = vld [vmem:[#allocation1 + $0x1] sm:$0x1]   ;;  %v6_v2 = vld [vmem:[#allocation1] sm:$0x1]  }
   0xa   :  { %11 = vrot.lane.b32.xlu0 %v10_v1, %s22_s0  ;;  %8 = vst.msk [vmem:[#allocation0] sm:$0x1] %vm7_vm0, %v6_v2  }
  0x7c   :  { %v12_v3 = vpop.permute.xlu0 %11  }
  0x7d   :  { %14 = vst.msk [vmem:[#allocation0] sm:$0x1] %vm13_vm1, %v12_v3  }
  0x84   :  { %v18_v4 = vld [vmem:[#allocation0] sm:$0x1] }
  0x85   :  { %20 = vst [vmem:[%s40_s1] sm:$0x1] %v18_v4 }

// kernel: tile.8
= control target key start
LH: loop header
LB: loop body
LE: loop exit
PB: predicated region body
PF: predicated region fallthrough
CT: control target
= control target key end

     0   :  { %s22_s0 = inlined_call_operand.vmem [shape: f32[4], index: 0, kind: input, shape index: {}]   ;;  %s23_s1 = inlined_call_operand.vmem [shape: f32[2,4], index: 1, kind: output, shape index: {}]  }
   0x1   :  { %v4_v0 = vld [vmem:[%s22_s0] ss:$0 sm:$0xff] }
   0x2   :  { %5 = vst [vmem:[%s23_s1] sm:$0x3] %v4_v0 }

// kernel: up_forward.1
= control target key start
LH: loop header
LB: loop body
LE: loop exit
PB: predicated region body
PF: predicated region fallthrough
CT: control target
= control target key end

     0   :  { %s1319_s27 = smov 0   ;;  %s1481_s0 = inlined_call_operand.vmem [shape: f32[2,8,8], index: 0, kind: input, shape index: {}]   ;;  %s1482_s1 = inlined_call_operand.vmem [shape: f32[2,18,4], index: 1, kind: input, shape index: {}]   ;;  %s1483_s2 = inlined_call_operand.vmem [shape: f32[8,8], index: 2, kind: input, shape index: {}]   ;;  %s1484_s3 = inlined_call_operand.vmem [shape: f32[1,8], index: 3, kind: input, shape index: {}]   ;;  %s1485_s4 = inlined_call_operand.vmem [shape: f32[24,4], index: 4, kind: input, shape index: {}]   ;;  %s1486_s5 = inlined_call_operand.vmem [shape: f32[1,4], index: 5, kind: input, shape index: {}]   ;;  %s1487_s6 = inlined_call_operand.vmem [shape: f32[12,4], index: 6, kind: input, shape index: {}]   ;;  %s1488_s7 = inlined_call_operand.vmem [shape: f32[1,4], index: 7, kind: input, shape index: {}]   ;;  %s1489_s8 = inlined_call_operand.vmem [shape: f32[2,18,4], index: 8, kind: output, shape index: {}]  }
   0x1 LB: > { %s1119_s28 = sadd.s32 4294967295, %s1269_s27   ;;  %p1123_p0 = scmp.ge.s32.totalorder %s1269_s27, 1  ;;  %s1269_s27 = sphi %s1319_s27, %s18_s27  }
   0x2   : > { %p271_p1 = scmp.lt.s32.totalorder %s1269_s27, 3 }
   0x4   : > { %p272_p2 = pnand %p1123_p0, %p271_p1 }
   0x5   : > { %v324_v0 = vld [vmem:[%s1483_s2] sm:$0xff] (!%p272_p2)  ;;  %p309_p3 = scmp.lt.s32.totalorder (!%p272_p2), %s1119_s28, 1  ;;  %vm406_vm0 = vcmask (!%p272_p2), 58368   ;;  %v1271_v1 = vmov (!%p272_p2), 0.0   ;;  %vm1272_vm1 = vmmov (!%p272_p2), 0   ;;  %vm332_vm2 = vcmask (!%p272_p2), 64512  }
   0x6   : > { %275 = sbr.rel (%p272_p2) target bundleno = 847 (0x34f), region = 52  ;;  %1180 = vmatprep.subr.mxu0 (!%p272_p2), %v1271_v1  ;;  %1182 = vmatprep.mubr.msk.f32.mxu0 (!%p272_p2), %vm1272_vm1, %v1271_v1  ;;  %407 = vst.msk [vmem:[#allocation2] sm:$0x3] (!%p272_p2), %vm406_vm0, %v1271_v1  ;;  %408 = vst.msk [vmem:[#allocation2 + $0x12] sm:$0x3] (!%p272_p2), %vm406_vm0, %v1271_v1  ;;  %vm412_vm3 = vcmask (!%p272_p2), 31744  }
   0x7   : > { %1181 = vmatpush3.msra.mxu0 (!%p272_p2), %v324_v0  ;;  %1185 = vmatprep.subr.mxu1 (!%p272_p2), %v1271_v1  ;;  %vm415_vm4 = vcmask (!%p272_p2), 25600   ;;  %v448_v6 = vld [vmem:[%s1485_s4] sm:$0xff] (!%p272_p2)  ;;  %v449_v8 = vld [vmem:[%s1485_s4 + $0x8] sm:$0xff] (!%p272_p2)  ;;  %vm421_vm5 = vcmask (!%p272_p2), 57376   ;;  %vm424_vm6 = vcmask (!%p272_p2), 58401   ;;  %vm427_vm7 = vcmask (!%p272_p2), 59426  }
   0x8   : > { %1196 = vmatprep.subr.mxu0 (!%p272_p2), %v1271_v1  ;;  %1187 = vmatprep.mubr.msk.f32.mxu1 (!%p272_p2), %vm1272_vm1, %v1271_v1  ;;  %v1127_v7 = vld [vmem:[%s1484_s3] ss:$0 sm:$0xff] (!%p272_p2)  ;;  %vm430_vm8 = vcmask (!%p272_p2), 60451   ;;  %vm433_vm9 = vcmask (!%p272_p2), 61476   ;;  %vm436_vm10 = vcmask (!%p272_p2), 62501   ;;  %vm439_vm11 = vcmask (!%p272_p2), 63526  }
   0x9   : > { %1186 = vmatpush3.msra.mxu1 (!%p272_p2), %v449_v8  ;;  %vm442_vm12 = vcmask (!%p272_p2), 64551   ;;  %s1273_s23 = smov (!%p272_p2), 4   ;;  %vm453_vm13 = vcmask (!%p272_p2), 1046528   ;;  %v631_v18 = vld [vmem:[%s1485_s4 + $0x10] sm:$0xff] (!%p272_p2)  ;;  %vm632_vm14 = vcmask (!%p272_p2), 1045504   ;;  %vm740_vm15 = vcmask (!%p272_p2), 24576  }
   0xa   : > { %1207 = vmatprep.subr.mxu1 (!%p272_p2), %v1271_v1  ;;  %741 = vst.msk [vmem:[#allocation3] sm:$0x1] (!%p272_p2), %vm740_vm15, %v1271_v1  ;;  %742 = vst.msk [vmem:[#allocation3 + $0x13] sm:$0x1] (!%p272_p2), %vm740_vm15, %v1271_v1  ;;  %vm765_vm0 = vcmask (!%p272_p2), 1043456  }
   0xb   : > { %v749_v27 = vld [vmem:[%s1487_s6] sm:$0xf] (!%p272_p2)  ;;  %v750_v28 = vld [vmem:[%s1487_s6 + $0x4] sm:$0xf] (!%p272_p2)  ;;  %v938_v0 = vld [vmem:[%s1487_s6 + $0x8] sm:$0xf] (!%p272_p2) }
   0xc   : > { %v1138_v45 = vld [vmem:[%s1486_s5] ss:$0 sm:$0xff] (!%p272_p2) }
   0xd   : > { %s1491_s28 = smov (!%p309_p3, %s1119_s28), 1 }
   0xe   : > { %s1124_s9 = sshll.u32 %s1491_s28, 3  ;;  %s1251_s10 = smul.u32 24, %s1491_s28 }
   0xf   : > { %s312_s13 = scalar_lea.vmem %s1481_s0, %s1124_s9 }
  0x10   : > { %s317_s16 = scalar_lea.vmem %s1482_s1, %s1251_s10  ;;  %v323_v2 = vld [vmem:[%s312_s13] sm:$0xff]  ;;  %s322_s19 = scalar_lea.vmem %s1489_s8, %s1251_s10 }
  0x11   : > { %1183 = vmatmul.mubr.msk.f32.vlgmr.msra.gmra.mrb[0].mxu0 %vm332_vm2, %v323_v2  ;;  %v409_v3 = vld [vmem:[%s317_s16] sm:$0xff]  ;;  %v410_v4 = vld [vmem:[%s317_s16 + $0x8] sm:$0xff]  ;;  %v411_v5 = vld [vmem:[%s317_s16 + $0x10] sm:$0x3] }
  0x12   : > { %413 = vst.msk [vmem:[#allocation2 + $0x1] sm:$0xff] %vm412_vm3, %v409_v3  ;;  %414 = vst.msk [vmem:[#allocation2 + $0x9] sm:$0xff] %vm412_vm3, %v410_v4  ;;  %1198 = vmatprep.mubr.msk.f32.mxu0 %vm1272_vm1, %v1271_v1  ;;  %1197 = vmatpush3.msra.mxu0 %v448_v6 }
  0x13   : > { %416 = vst.msk [vmem:[#allocation2 + $0x11] sm:$0x3] %vm415_vm4, %v411_v5  ;;  %1218 = vmatprep.subr.mxu0 %v1271_v1 }
  0xe4   : > { %v402_v9 = vpop.f32.mrb[0].mxu0 }
  0xe5   : > { %v403_v10 = vadd.f32 %v1127_v7, %v402_v9  ;;  %v1184_v11 = vpop.f32.mrb[1].mxu0 }
  0xe7   : > { %418 = vrot.lane.b32.xlu0 %v403_v10, %s1273_s23  ;;  %423 = vst.msk [vmem:[#allocation2 + $0x3] sm:$0x1] %vm421_vm5, %v403_v10 }
  0xe8   : > { %426 = vst.msk [vmem:[#allocation2 + $0x4] sm:$0x2] %vm424_vm6, %v403_v10 }
  0xe9   : > { %429 = vst.msk [vmem:[#allocation2 + $0x5] sm:$0x4] %vm427_vm7, %v403_v10 }
  0xea   : > { %432 = vst.msk [vmem:[#allocation2 + $0x6] sm:$0x8] %vm430_vm8, %v403_v10 }
  0xeb   : > { %435 = vst.msk [vmem:[#allocation2 + $0x7] sm:$0x10] %vm433_vm9, %v403_v10 }
  0xec   : > { %438 = vst.msk [vmem:[#allocation2 + $0x8] sm:$0x20] %vm436_vm10, %v403_v10 }
  0xed   : > { %441 = vst.msk [vmem:[#allocation2 + $0x9] sm:$0x40] %vm439_vm11, %v403_v10 }
  0xee   : > { %444 = vst.msk [vmem:[#allocation2 + $0xa] sm:$0x80] %vm442_vm12, %v403_v10 }
 0x159   : > { %v419_v12 = vpop.permute.xlu0 %418 }
 0x15a   : > { %422 = vst.msk [vmem:[#allocation2 + $0x2] sm:$0x1] %vm421_vm5, %v419_v12 }
 0x15b   : > { %425 = vst.msk [vmem:[#allocation2 + $0x3] sm:$0x2] %vm424_vm6, %v419_v12 }
 0x15c   : > { %428 = vst.msk [vmem:[#allocation2 + $0x4] sm:$0x4] %vm427_vm7, %v419_v12 }
 0x15d   : > { %431 = vst.msk [vmem:[#allocation2 + $0x5] sm:$0x8] %vm430_vm8, %v419_v12 }
 0x15e   : > { %434 = vst.msk [vmem:[#allocation2 + $0x6] sm:$0x10] %vm433_vm9, %v419_v12 }
 0x15f   : > { %437 = vst.msk [vmem:[#allocation2 + $0x7] sm:$0x20] %vm436_vm10, %v419_v12 }
 0x160   : > { %440 = vst.msk [vmem:[#allocation2 + $0x8] sm:$0x40] %vm439_vm11, %v419_v12 }
 0x161   : > { %443 = vst.msk [vmem:[#allocation2 + $0x9] sm:$0x80] %vm442_vm12, %v419_v12 }
 0x163   : > { %v445_v13 = vld [vmem:[#allocation2] sm:$0xff] }
 0x164   : > { %1199 = vmatmul.mubr.msk.f32.vlgmr.msra.gmra.mrb[2].mxu0 %vm332_vm2, %v445_v13  ;;  %v454_v16 = vrot.slane %v445_v13, 1  ;;  %v633_v22 = vrot.slane %v445_v13, 2 }
 0x165   : > { %1201 = vmatprep.mubr.msk.f32.mxu0 %vm1272_vm1, %v1271_v1  ;;  %1219 = vmatpush3.msk.msra.mxu0 %vm765_vm0, %v750_v28 }
 0x166   : > { %1240 = vmatprep.subr.mxu0 %v1271_v1 }
 0x167   : > { %v446_v14 = vld [vmem:[#allocation2 + $0x8] sm:$0xff] }
 0x168   : > { %v447_v15 = vld [vmem:[#allocation2 + $0x10] sm:$0xf]  ;;  %v455_v17 = vrot.slane %v446_v14, 1  ;;  %1202 = vmatmul.mubr.msk.f32.gmra.mrb[4].mxu0 %vm332_vm2, %v446_v14  ;;  %v634_v23 = vrot.slane %v446_v14, 2 }
 0x169   : > { %v457_v20 = vrot.slane %v447_v15, 1  ;;  %1204 = vmatprep.mubr.msk.f32.mxu0 %vm1272_vm1, %v1271_v1  ;;  %v636_v25 = vrot.slane %v447_v15, 2 }
 0x16a   : > { %v456_v19 = vsel %vm453_vm13, %v454_v16, %v455_v17  ;;  %v635_v24 = vsel %vm632_vm14, %v633_v22, %v634_v23 }
 0x16b   : > { %1188 = vmatmul.mubr.msk.f32.vlgmr.msra.gmra.mrb[0].mxu1 %vm332_vm2, %v456_v19  ;;  %v458_v21 = vsel %vm453_vm13, %v455_v17, %v457_v20  ;;  %v637_v26 = vsel %vm632_vm14, %v634_v23, %v636_v25 }
 0x16c   : > { %1208 = vmatpush3.msra.mxu1 %v631_v18  ;;  %1190 = vmatprep.mubr.msk.f32.mxu1 %vm1272_vm1, %v1271_v1 }
 0x16d   : > { %1229 = vmatprep.subr.mxu1 %v1271_v1  ;;  %1205 = vmatmul.mubr.msk.f32.gmra.mrb[6].mxu0 %vm332_vm2, %v447_v15 }
 0x16e   : > { %1220 = vmatprep.mubr.msk.f32.mxu0 %vm1272_vm1, %v1271_v1 }
 0x16f   : > { %1191 = vmatmul.mubr.msk.f32.gmra.mrb[2].mxu1 %vm332_vm2, %v458_v21 }
 0x170   : > { %1193 = vmatprep.mubr.msk.f32.mxu1 %vm1272_vm1, %v1271_v1 }
 0x173   : > { %1194 = vmatmul.mubr.msk.f32.gmra.mrb[4].mxu1 %vm332_vm2, %v457_v20 }
 0x174   : > { %1209 = vmatprep.mubr.msk.f32.mxu1 %vm1272_vm1, %v1271_v1 }
 0x177   : > { %1210 = vmatmul.mubr.msk.f32.vlgmr.msra.gmra.mrb[6].mxu1 %vm332_vm2, %v635_v24 }
 0x178   : > { %1212 = vmatprep.mubr.msk.f32.mxu1 %vm1272_vm1, %v1271_v1  ;;  %1230 = vmatpush3.msk.msra.mxu1 %vm765_vm0, %v749_v27 }
 0x17b   : > { %1213 = vmatmul.mubr.msk.f32.gmra.mrb[8].mxu1 %vm332_vm2, %v637_v26 }
 0x17c   : > { %1215 = vmatprep.mubr.msk.f32.mxu1 %vm1272_vm1, %v1271_v1 }
 0x17f   : > { %1216 = vmatmul.mubr.msk.f32.gmra.mrb[10].mxu1 %vm332_vm2, %v636_v25 }
 0x180   : > { %1231 = vmatprep.mubr.msk.f32.mxu1 %vm1272_vm1, %v1271_v1 }
 0x237   : > { %v617_v29 = vpop.f32.mrb[2].mxu0 }
 0x238   : > { %v1200_v30 = vpop.f32.mrb[3].mxu0 }
 0x23b   : > { %v622_v34 = vpop.f32.mrb[4].mxu0 }
 0x23c   : > { %v1203_v35 = vpop.f32.mrb[5].mxu0 }
 0x23e   : > { %v531_v31 = vpop.f32.mrb[0].mxu1 }
 0x23f   : > { %v618_v32 = vadd.f32 %v617_v29, %v531_v31  ;;  %v1189_v33 = vpop.f32.mrb[1].mxu1 }
 0x240   : > { %v627_v39 = vpop.f32.mrb[6].mxu0 }
 0x241   : > { %v1206_v40 = vpop.f32.mrb[7].mxu0 }
 0x242   : > { %v536_v36 = vpop.f32.mrb[2].mxu1 }
 0x243   : > { %v623_v37 = vadd.f32 %v622_v34, %v536_v36  ;;  %v1192_v38 = vpop.f32.mrb[3].mxu1 }
 0x246   : > { %v541_v41 = vpop.f32.mrb[4].mxu1 }
 0x247   : > { %v628_v42 = vadd.f32 %v627_v39, %v541_v41  ;;  %v1195_v43 = vpop.f32.mrb[5].mxu1 }
 0x24a   : > { %v710_v44 = vpop.f32.mrb[6].mxu1 }
 0x24b   : > { %v724_v46 = vadd.f32 %v710_v44, %v618_v32  ;;  %v1211_v47 = vpop.f32.mrb[7].mxu1 }
 0x24d   : > { %v734_v48 = vadd.f32 %v1138_v45, %v724_v46 }
 0x24e   : > { %v715_v49 = vpop.f32.mrb[8].mxu1 }
 0x24f   : > { %v737_v50 = vmax.f32 %v734_v48, 0.0  ;;  %v725_v51 = vadd.f32 %v715_v49, %v623_v37  ;;  %v1214_v52 = vpop.f32.mrb[9].mxu1 }
 0x251   : > { %743 = vst.msk [vmem:[#allocation3 + $0x1] sm:$0xff] %vm412_vm3, %v737_v50  ;;  %v735_v53 = vadd.f32 %v1138_v45, %v725_v51 }
 0x252   : > { %v720_v54 = vpop.f32.mrb[10].mxu1 }
 0x253   : > { %v738_v55 = vmax.f32 %v735_v53, 0.0  ;;  %v726_v56 = vadd.f32 %v720_v54, %v628_v42  ;;  %v1217_v57 = vpop.f32.mrb[11].mxu1 }
 0x255   : > { %744 = vst.msk [vmem:[#allocation3 + $0x9] sm:$0xff] %vm412_vm3, %v738_v55  ;;  %v736_v58 = vadd.f32 %v1138_v45, %v726_v56 }
 0x257   : > { %v739_v59 = vmax.f32 %v736_v58, 0.0 }
 0x258   : > { %v746_v60 = vld [vmem:[#allocation3] sm:$0xff] }
 0x259   : > { %745 = vst.msk [vmem:[#allocation3 + $0x11] sm:$0x3] %vm415_vm4, %v739_v59  ;;  %1232 = vmatmul.mubr.msk.f32.vlgmr.msra.gmra.mrb[12].mxu1 %vm412_vm3, %v746_v60  ;;  %v754_v62 = vrot.slane %v746_v60, 1  ;;  %v939_v7 = vrot.slane %v746_v60, 2 }
 0x25a   : > { %1234 = vmatprep.mubr.msk.f32.mxu1 %vm1272_vm1, %v1271_v1 }
 0x25c   : > { %v747_v61 = vld [vmem:[#allocation3 + $0x8] sm:$0xff] }
 0x25d   : > { %v755_v63 = vrot.slane %v747_v61, 1  ;;  %1235 = vmatmul.mubr.msk.f32.gmra.mrb[14].mxu1 %vm412_vm3, %v747_v61  ;;  %v940_v6 = vrot.slane %v747_v61, 2 }
 0x25e   : > { %1237 = vmatprep.mubr.msk.f32.mxu1 %vm1272_vm1, %v1271_v1 }
 0x25f   : > { %v756_v2 = vsel %vm453_vm13, %v754_v62, %v755_v63  ;;  %v941_v9 = vsel %vm632_vm14, %v939_v7, %v940_v6 }
 0x260   : > { %1221 = vmatmul.mubr.msk.f32.vlgmr.msra.gmra.mrb[8].mxu0 %vm412_vm3, %v756_v2  ;;  %v748_v3 = vld [vmem:[#allocation3 + $0x10] sm:$0xf] }
 0x261   : > { %1241 = vmatpush3.msk.msra.mxu0 %vm765_vm0, %v938_v0  ;;  %v757_v4 = vrot.slane %v748_v3, 1  ;;  %1238 = vmatmul.mubr.msk.f32.gmra.mrb[16].mxu1 %vm412_vm3, %v748_v3  ;;  %v942_v8 = vrot.slane %v748_v3, 2 }
 0x262   : > { %1223 = vmatprep.mubr.msk.f32.mxu0 %vm1272_vm1, %v1271_v1 }
 0x263   : > { %v758_v5 = vsel %vm453_vm13, %v755_v63, %v757_v4  ;;  %v943_v10 = vsel %vm632_vm14, %v940_v6, %v942_v8 }
 0x264   : > { %1224 = vmatmul.mubr.msk.f32.gmra.mrb[10].mxu0 %vm412_vm3, %v758_v5 }
 0x265   : > { %1226 = vmatprep.mubr.msk.f32.mxu0 %vm1272_vm1, %v1271_v1 }
 0x268   : > { %1227 = vmatmul.mubr.msk.f32.gmra.mrb[12].mxu0 %vm412_vm3, %v757_v4 }
 0x269   : > { %1242 = vmatprep.mubr.msk.f32.mxu0 %vm1272_vm1, %v1271_v1 }
 0x26c   : > { %1243 = vmatmul.mubr.msk.f32.vlgmr.msra.gmra.mrb[14].mxu0 %vm412_vm3, %v941_v9 }
 0x26d   : > { %1245 = vmatprep.mubr.msk.f32.mxu0 %vm1272_vm1, %v1271_v1 }
 0x270   : > { %1246 = vmatmul.mubr.msk.f32.gmra.mrb[16].mxu0 %vm412_vm3, %v943_v10 }
 0x271   : > { %1248 = vmatprep.mubr.msk.f32.mxu0 %vm1272_vm1, %v1271_v1  ;;  %v1151_v1 = vld [vmem:[%s1488_s7] ss:$0 sm:$0xff] }
 0x274   : > { %1249 = vmatmul.mubr.msk.f32.gmra.mrb[18].mxu0 %vm412_vm3, %v942_v8 }
 0x32c   : > { %v924_v11 = vpop.f32.mrb[12].mxu1 }
 0x32d   : > { %v1233_v12 = vpop.f32.mrb[13].mxu1 }
 0x330   : > { %v929_v13 = vpop.f32.mrb[14].mxu1 }
 0x331   : > { %v1236_v14 = vpop.f32.mrb[15].mxu1 }
 0x333   : > { %v835_v15 = vpop.f32.mrb[8].mxu0 }
 0x334   : > { %v925_v16 = vadd.f32 %v924_v11, %v835_v15  ;;  %v1222_v17 = vpop.f32.mrb[9].mxu0  ;;  %v934_v18 = vpop.f32.mrb[16].mxu1 }
 0x335   : > { %v1239_v19 = vpop.f32.mrb[17].mxu1 }
 0x337   : > { %v840_v20 = vpop.f32.mrb[10].mxu0 }
 0x338   : > { %v930_v21 = vadd.f32 %v929_v13, %v840_v20  ;;  %v1225_v22 = vpop.f32.mrb[11].mxu0 }
 0x33b   : > { %v845_v23 = vpop.f32.mrb[12].mxu0 }
 0x33c   : > { %v935_v24 = vadd.f32 %v934_v18, %v845_v23  ;;  %v1228_v25 = vpop.f32.mrb[13].mxu0 }
 0x33f   : > { %v1019_v26 = vpop.f32.mrb[14].mxu0 }
 0x340   : > { %v1033_v27 = vadd.f32 %v1019_v26, %v925_v16  ;;  %v1244_v28 = vpop.f32.mrb[15].mxu0 }
 0x342   : > { %v1043_v29 = vadd.f32 %v1151_v1, %v1033_v27 }
 0x343   : > { %v1024_v30 = vpop.f32.mrb[16].mxu0 }
 0x344   : > { %v1046_v31 = vmax.f32 %v1043_v29, 0.0  ;;  %v1034_v32 = vadd.f32 %v1024_v30, %v930_v21  ;;  %v1247_v33 = vpop.f32.mrb[17].mxu0 }
 0x346   : > { %1049 = vst.msk [vmem:[%s322_s19] sm:$0xff] %vm412_vm3, %v1046_v31  ;;  %v1044_v34 = vadd.f32 %v1151_v1, %v1034_v32 }
 0x347   : > { %v1029_v35 = vpop.f32.mrb[18].mxu0 }
 0x348   : > { %v1047_v36 = vmax.f32 %v1044_v34, 0.0  ;;  %v1035_v37 = vadd.f32 %v1029_v35, %v935_v24  ;;  %v1250_v38 = vpop.f32.mrb[19].mxu0 }
 0x34a   : > { %1050 = vst.msk [vmem:[%s322_s19 + $0x8] sm:$0xff] %vm412_vm3, %v1047_v36  ;;  %v1045_v39 = vadd.f32 %v1151_v1, %v1035_v37 }
 0x34c   : > { %v1048_v40 = vmax.f32 %v1045_v39, 0.0 }
 0x34e   : > { %1051 = vst.msk [vmem:[%s322_s19 + $0x10] sm:$0x3] %vm415_vm4, %v1048_v40 }
 0x34f PF: > { %s18_s27 = sadd.s32 1, %s1269_s27  }
 0x350   : > { %p15_p4 = scmp.ge.s32.totalorder %s18_s27, 4  }
 0x352   :  { %17 = sbr.rel (!%p15_p4) target bundleno = 1 (0x1), region = 85 }

</bundles_post_ra>
